<compile_context>
chip_gen: v6e
topology: v6e:2x2x1
jax: 0.10.0
libtpu: 0.0.40
codegen_flags: <defaults>
</compile_context>

<pallas_src>
import jax
import jax.numpy as jnp
from jax.experimental import pallas as pl
from jax.experimental.pallas import tpu as pltpu

_LANES = 128
_SOFTPLUS_THRESHOLD = 20.0


def _mish_kernel(x_ref, o_ref):
    xf = x_ref[...].astype(jnp.float32)
    # tanh(softplus(x)) = t*(t+2) / (t*(t+2) + 2),  t = exp(x).
    # Clamp exp's argument at the PyTorch softplus threshold (20): above it
    # softplus(x) == x and tanh(x) == 1 in f32 (so y == x via the select), and
    # the clamp keeps exp finite even on masked edge-block garbage.
    t = jnp.exp(jnp.minimum(xf, _SOFTPLUS_THRESHOLD))
    num = t * (t + 2.0)
    den = num + 2.0
    # EUP approx reciprocal + one Newton-Raphson step (VALU) recovers f32
    # accuracy while avoiding the multi-pass f32 divide (EUP stays unsaturated).
    r = pl.reciprocal(den, approx=True)
    r = r * (2.0 - den * r)
    y = jnp.where(xf > _SOFTPLUS_THRESHOLD, xf, xf * (num * r))
    o_ref[...] = y.astype(o_ref.dtype)


def _mish_jax(x):
    """Pure-JAX Mish matching PyTorch x * tanh(F.softplus(x)) (threshold 20)."""
    xf = x.astype(jnp.float32)
    sp = jnp.log1p(jnp.exp(-jnp.abs(xf))) + jnp.maximum(xf, 0.0)
    sp = jnp.where(xf > _SOFTPLUS_THRESHOLD, xf, sp)
    return (xf * jnp.tanh(sp)).astype(x.dtype)


def _round_up(v, m):
    return ((v + m - 1) // m) * m


def mish(x):
    """Elementwise Mish via a Pallas TPU kernel. Works for any shape/dtype."""
    orig_shape = x.shape
    orig_dtype = x.dtype
    total = x.size
    if total == 0:
        return x

    flat = jnp.ravel(x)                # contiguous -> free reshape
    rem = total % _LANES
    main = total - rem
    if main == 0:
        # <128 elements total: kernel launch overhead dominates, use pure JAX.
        return _mish_jax(flat).reshape(orig_shape)

    main_flat = flat if rem == 0 else flat[:main]
    rows = main // _LANES
    slab = main_flat.reshape(rows, _LANES)

    itemsize = jnp.dtype(orig_dtype).itemsize
    # Packed sublane multiple: 8 for 4-byte, 16 for 2-byte, 32 for 1-byte dtypes.
    sublane_mult = max(8, 32 // max(itemsize, 1))

    TARGET_BLOCK_BYTES = 4 * 1024 * 1024   # 16 MiB live w/ double-buffered in+out
    SMALL_SLAB_BYTES = 256 * 1024
    MIN_BLOCKS = 4                          # v7x megacore: 2 TCs, >=2 blocks each

    max_rows = max(
        sublane_mult,
        (TARGET_BLOCK_BYTES // (_LANES * itemsize)) // sublane_mult * sublane_mult,
    )
    slab_bytes = rows * _LANES * itemsize
    if slab_bytes <= SMALL_SLAB_BYTES or rows <= sublane_mult:
        # Small slab: single full-extent block (always layout-legal).
        row_tile = rows
    else:
        # Balanced multi-block grid: at least MIN_BLOCKS blocks, ~equal sizes,
        # each <= max_rows, rounded to the packed sublane multiple.
        target_blocks = max(MIN_BLOCKS, pl.cdiv(rows, max_rows))
        row_tile = min(max_rows, _round_up(pl.cdiv(rows, target_blocks), sublane_mult))
    grid = (pl.cdiv(rows, row_tile),)

    block_bytes = row_tile * _LANES * itemsize
    # 2x double-buffered input + 2x double-buffered output + headroom; explicit
    # so v5e's 16 MiB scoped default never gates 4 MiB blocks and v7x's 64 MiB
    # physical VMEM is never exceeded.
    vmem_limit = int(min(4 * block_bytes + 4 * 1024 * 1024, 56 * 1024 * 1024))

    out = pl.pallas_call(
        _mish_kernel,
        out_shape=jax.ShapeDtypeStruct((rows, _LANES), orig_dtype),
        grid_spec=pltpu.PrefetchScalarGridSpec(
            num_scalar_prefetch=0,
            grid=grid,
            in_specs=[pl.BlockSpec((row_tile, _LANES), lambda i: (i, 0))],
            out_specs=pl.BlockSpec((row_tile, _LANES), lambda i: (i, 0)),
        ),
        compiler_params=pltpu.CompilerParams(
            dimension_semantics=("parallel",),
            vmem_limit_bytes=vmem_limit,
        ),
    )(slab)

    out_flat = out.reshape(main)
    if rem != 0:
        # TODO(synk): a masked pltpu.store tail block inside the kernel would
        # avoid this tiny (<128-element) pure-JAX epilogue + concatenate.
        out_flat = jnp.concatenate([out_flat, _mish_jax(flat[main:])])
    return out_flat.reshape(orig_shape)


if __name__ == "__main__":
    key = jax.random.PRNGKey(0)
    # NCHW input: batch=2, channels=4, spatial=16x16
    x = jax.random.normal(key, (2, 4, 16, 16), dtype=jnp.float32) * 3.0

    y = jax.block_until_ready(mish(x))

    y_ref = _mish_jax(x)
    assert y.shape == x.shape and y.dtype == x.dtype
    assert jnp.allclose(y, y_ref, atol=1e-5, rtol=1e-5)

    print("KERNEL_OK")
</pallas_src>

<mosaic_0001>
module attributes {stable_mosaic.version = 11 : i64} {
  func.func @_mish_kernel(%arg0: i32, %arg1: memref<16x128xf32, #tpu.memory_space<vmem>>, %arg2: memref<16x128xf32, #tpu.memory_space<vmem>>) attributes {dimension_semantics = [#tpu.dimension_semantics<parallel>], iteration_bounds = array<i64: 1>, scalar_prefetch = 0 : i64, scratch_operands = 0 : i64, tpu.core_type = #tpu.core_type<tc>, window_params = [{transform_indices = @transform_0, window_bounds = array<i64: 16, 128>}, {transform_indices = @transform_1, window_bounds = array<i64: 16, 128>}]} {
    %c0 = arith.constant 0 : index
    %c0_0 = arith.constant 0 : index
    %0 = vector.load %arg1[%c0, %c0_0] : memref<16x128xf32, #tpu.memory_space<vmem>>, vector<16x128xf32>
    %cst = arith.constant 2.000000e+01 : f32
    %1 = vector.broadcast %cst : f32 to vector<16x128xf32>
    %2 = arith.minimumf %0, %1 : vector<16x128xf32>
    %3 = math.exp %2 : vector<16x128xf32>
    %cst_1 = arith.constant 2.000000e+00 : f32
    %4 = vector.broadcast %cst_1 : f32 to vector<16x128xf32>
    %5 = arith.addf %3, %4 : vector<16x128xf32>
    %6 = arith.mulf %3, %5 : vector<16x128xf32>
    %cst_2 = arith.constant 2.000000e+00 : f32
    %7 = vector.broadcast %cst_2 : f32 to vector<16x128xf32>
    %8 = arith.addf %6, %7 : vector<16x128xf32>
    %9 = tpu.reciprocal %8 {approx = true} : vector<16x128xf32> -> vector<16x128xf32>
    %10 = arith.mulf %8, %9 : vector<16x128xf32>
    %cst_3 = arith.constant 2.000000e+00 : f32
    %11 = vector.broadcast %cst_3 : f32 to vector<16x128xf32>
    %12 = arith.subf %11, %10 : vector<16x128xf32>
    %13 = arith.mulf %9, %12 : vector<16x128xf32>
    %cst_4 = arith.constant 2.000000e+01 : f32
    %14 = vector.broadcast %cst_4 : f32 to vector<16x128xf32>
    %15 = arith.cmpf ogt, %0, %14 : vector<16x128xf32>
    %16 = arith.mulf %6, %13 : vector<16x128xf32>
    %17 = arith.mulf %0, %16 : vector<16x128xf32>
    %18 = arith.select %15, %0, %17 : vector<16x128xi1>, vector<16x128xf32>
    %c0_5 = arith.constant 0 : index
    %c0_6 = arith.constant 0 : index
    %19 = vector.load %arg2[%c0_5, %c0_6] : memref<16x128xf32, #tpu.memory_space<vmem>>, vector<16x128xf32>
    tpu.vector_store %arg2[%c0_5, %c0_6], %18 {strides = array<i32>} : memref<16x128xf32, #tpu.memory_space<vmem>>, vector<16x128xf32>,
    return
  }
  func.func @transform_0(%arg0: i32) -> (i32, i32) {
    %c0_i32 = arith.constant 0 : i32
    %c0_i32_0 = arith.constant 0 : i32
    return %arg0, %c0_i32 : i32, i32
  }
  func.func @transform_1(%arg0: i32) -> (i32, i32) {
    %c0_i32 = arith.constant 0 : i32
    %c0_i32_0 = arith.constant 0 : i32
    return %arg0, %c0_i32 : i32, i32
  }
}

</mosaic_0001>

<bundles_post_ra>
// kernel: tpu_custom_call.1
= control target key start
LH: loop header
LB: loop body
LE: loop exit
PB: predicated region body
PF: predicated region fallthrough
CT: control target
= control target key end

     0   :  { %6 = vsyncpa [#allocation3], 0  ;;  %s154_s0 = inlined_call_operand.hbm [shape: f32[16,128], index: 0, kind: input, shape index: {}]   ;;  %s155_s1 = inlined_call_operand.hbm [shape: f32[16,128], index: 1, kind: output, shape index: {}]  }
   0x1   :  { %7 = vsyncpa [#allocation4], 0  ;;  %s128_s6 = smov [#allocation2]  }
   0x2   :  { %s13_s7 = sshll.u32 %s128_s6, 4  ;;  %s14_s7 = int_to_ptr.vmem [resolvable:$true] %s13_s7 }
   0x3   :  { %s92_s8 = scalar_lea.vmem %s14_s7, 256  ;;  %p97_p1 = scmp.lt.s32.totalorder %s14_s7, %s14_s7 }
   0x4   :  { %p93_p0 = scmp.ne.s32.totalorder %s14_s7, %s92_s8  ;;  %p98_p2 = scmp.lt.s32.totalorder %s92_s8, %s92_s8 }
   0x6   :  { %p99_p3 = por %p98_p2, %p97_p1 }
   0x8   :  { %p100_p4 = pnand %p99_p3, %p93_p0 }
   0xa   :  { %103 = shalt.err (!%p100_p4)
}
   0xb   :  { %s129_s9 = smov 128   ;;  %s130_s10 = smov 8  }
   0xc   :  { %19 = dma.hbm_to_vmem [thread:$0]  %s154_s0, 256, %s14_s7, [#allocation3], %s129_s9, %s129_s9, %s130_s10  }
   0xd   :  { %124 = dma.done.wait [#allocation3], 256  }
   0xe   :  { %125 = vsyncadd [#allocation3], 4294967040  ;;  %v23_v0 = vld [vmem:[#allocation2] sm:$0xff]  ;;  %v24_v1 = vld [vmem:[#allocation2 + $0x8] sm:$0xff]  ;;  %s131_s0 = smov [#allocation5]  }
   0xf   :  { %v25_v2 = vmin.f32 %v23_v0, 20.0  ;;  %v26_v3 = vmin.f32 %v24_v1, 20.0  ;;  %vm45_vm0 = vcmp.gt.f32.partialorder %v23_v0, 20.0  ;;  %s60_s13 = sshll.u32 %s131_s0, 4  ;;  %vm46_vm1 = vcmp.gt.f32.partialorder %v24_v1, 20.0  ;;  %s61_s13 = int_to_ptr.vmem [resolvable:$true] %s60_s13 }
  0x10   :  { %s104_s14 = scalar_lea.vmem %s61_s13, 256  ;;  %p109_p6 = scmp.lt.s32.totalorder %s61_s13, %s61_s13 }
  0x11   :  { %v27_v4 = vmul.f32 1.442695, %v25_v2  ;;  %v29_v5 = vmul.f32 1.442695, %v26_v3  ;;  %p105_p5 = scmp.ne.s32.totalorder %s61_s13, %s104_s14  ;;  %p110_p7 = scmp.lt.s32.totalorder %s104_s14, %s104_s14 }
  0x13   :  { %76 = vpow2.f32 %v27_v4  ;;  %p111_p8 = por %p110_p7, %p109_p6 }
  0x14   :  { %78 = vpow2.f32 %v29_v5 }
  0x15   :  { %p112_p9 = pnand %p111_p8, %p105_p5 }
  0x20   :  { %v77_v6 = vpop.eup %76 }
  0x21   :  { %v79_v7 = vpop.eup %78  ;;  %v31_v8 = vadd.f32 2.0, %v77_v6 }
  0x22   :  { %v32_v9 = vadd.f32 2.0, %v79_v7 }
  0x23   :  { %v33_v10 = vmul.f32 %v77_v6, %v31_v8 }
  0x24   :  { %v34_v11 = vmul.f32 %v79_v7, %v32_v9 }
  0x25   :  { %v35_v12 = vadd.f32 2.0, %v33_v10 }
  0x26   :  { %v36_v13 = vadd.f32 2.0, %v34_v11 }
  0x27   :  { %80 = vrcp.f32 %v35_v12 }
  0x28   :  { %82 = vrcp.f32 %v36_v13 }
  0x34   :  { %v81_v14 = vpop.eup %80 }
  0x35   :  { %v83_v15 = vpop.eup %82  ;;  %v39_v16 = vmul.f32 %v81_v14, %v35_v12 }
  0x36   :  { %v40_v17 = vmul.f32 %v83_v15, %v36_v13 }
  0x37   :  { %v41_v18 = vsub.f32 2.0, %v39_v16 }
  0x38   :  { %v42_v19 = vsub.f32 2.0, %v40_v17 }
  0x39   :  { %v43_v20 = vmul.f32 %v81_v14, %v41_v18 }
  0x3a   :  { %v44_v21 = vmul.f32 %v83_v15, %v42_v19 }
  0x3b   :  { %v47_v22 = vmul.f32 %v43_v20, %v33_v10 }
  0x3c   :  { %v48_v23 = vmul.f32 %v44_v21, %v34_v11 }
  0x3d   :  { %v49_v24 = vmul.f32 %v47_v22, %v23_v0 }
  0x3e   :  { %v50_v25 = vmul.f32 %v48_v23, %v24_v1 }
  0x3f   :  { %v51_v26 = vsel %vm45_vm0, %v23_v0, %v49_v24 }
  0x40   :  { %53 = vst [vmem:[#allocation5] sm:$0xff] %v51_v26  ;;  %v52_v27 = vsel %vm46_vm1, %v24_v1, %v50_v25 }
  0x41   :  { %54 = vst [vmem:[#allocation5 + $0x8] sm:$0xff] %v52_v27 }
  0x42   :  { %115 = shalt.err (!%p112_p9)
}
  0x43   :  { %66 = dma.vmem_to_hbm [thread:$0]  %s61_s13, 256, %s155_s1, [#allocation4], %s129_s9, %s129_s9, %s130_s10  }
  0x44   :  { %126 = dma.done.wait [#allocation4], 256  }
  0x45   :  { %127 = vsyncadd [#allocation4], 4294967040 }
  0x46   :  { %70 = vsyncpa [#allocation3], 1 }
  0x47   :  { %71 = vsyncpa [#allocation4], 1 }

</bundles_post_ra>
